<compile_context>
chip_gen: v7x
topology: tpu7x:2x2x1
jax: 0.10.0
libtpu: 0.0.40
codegen_flags: <defaults>
</compile_context>

<pallas_src>
import math

import jax
import jax.numpy as jnp
from jax.experimental import pallas as pl
from jax.experimental.pallas import tpu as pltpu

STATE_DIM = 2
HIDDEN = 128
ACTION_DIM = 1


def _mlp_kernel(x_ref, w1t_ref, b1_ref, w2t_ref, b2_ref, w3_ref, b3_ref, o_ref):
    """One (feature, batch) tile of the 3-layer MLP.

    x_ref   : (STATE_DIM, TM)        input states, batch on lanes
    w1t_ref : (HIDDEN, STATE_DIM)    layer-1 weight (transposed), elementwise dtype
    b1_ref  : (HIDDEN, 1)
    w2t_ref : (HIDDEN, HIDDEN)       layer-2 weight (transposed), MXU operand dtype
    b2_ref  : (HIDDEN, 1)
    w3_ref  : (HIDDEN, ACTION_DIM)   layer-3 weight column
    b3_ref  : (1,) SMEM scalar
    o_ref   : (1, TM)                lane-dense logits row
    """
    act = w1t_ref.dtype                       # f32 (v5e-safe) or bf16 (v6e/v7x)
    x = x_ref[...].astype(act)                # (2, TM)
    w1t = w1t_ref[...]                        # (128, 2)

    # ---- Layer 1: Linear(2 -> 128) as outer-product FMAs on the VPU. ----
    # K = 2 would waste a full MXU push/drain; keep the MXU free for layer 2.
    h = w1t[:, 0:1] * x[0:1, :]
    for k in range(1, STATE_DIM):
        h = h + w1t[:, k:k + 1] * x[k:k + 1, :]
    h = jnp.maximum(h + b1_ref[...], 0.0)     # (128, TM), act dtype

    # ---- Layer 2: Linear(128 -> 128) on the MXU, f32 accumulation. ----
    h2 = jnp.dot(w2t_ref[...], h.astype(w2t_ref.dtype),
                 preferred_element_type=jnp.float32)           # (128, TM) f32
    h2 = jnp.maximum(h2.astype(act) + b2_ref[...], 0.0)        # (128, TM), act dtype

    # ---- Layer 3: Linear(128 -> 1) as VPU multiply + sublane reduction. ----
    # N = 1 on the MXU would use a single output row; VPU/XLU slots are idle anyway.
    prod = (h2 * w3_ref[...]).astype(jnp.float32)              # (128, TM) f32
    out = jnp.sum(prod, axis=0, keepdims=True)                 # (1, TM) f32
    o_ref[...] = (out + b3_ref[0]).astype(o_ref.dtype)


def prepare_params(w1, b1, w2, b2, w3, b3, *,
                   matmul_dtype=jnp.bfloat16, activation_dtype=jnp.float32):
    """One-time re-layout / cast of PyTorch-style params into kernel-ready form.

    Done once outside the hot path: w2 is pre-transposed and pre-cast to the MXU
    operand dtype (bf16 is the fast path on all TPU generations, with f32
    accumulation).  Use activation_dtype=jnp.bfloat16 on v6e/v7x to halve vreg /
    spill pressure for the elementwise work; keep float32 on v5e (no bf16 VPU).
    """
    assert w1.shape == (STATE_DIM, HIDDEN)
    assert w2.shape == (HIDDEN, HIDDEN)
    assert w3.shape == (HIDDEN, ACTION_DIM) and ACTION_DIM == 1, \
        "layer-3 reduction path assumes action_dim == 1"
    w1t = jnp.transpose(w1).astype(activation_dtype)            # (HIDDEN, STATE_DIM)
    b1c = jnp.reshape(b1, (HIDDEN, 1)).astype(activation_dtype)
    w2t = jnp.transpose(w2).astype(matmul_dtype)                # (HIDDEN, HIDDEN)
    b2c = jnp.reshape(b2, (HIDDEN, 1)).astype(activation_dtype)
    w3c = w3.astype(activation_dtype)                           # (HIDDEN, 1)
    b3s = jnp.reshape(b3, (ACTION_DIM,)).astype(jnp.float32)    # SMEM scalar
    return w1t, b1c, w2t, b2c, w3c, b3s


def cross_entropy_agent_forward(x, params, *, tile_m=2048):
    """Pallas CrossEntropyAgent.forward: x (B, STATE_DIM) f32 -> (B, ACTION_DIM) f32."""
    w1t, b1c, w2t, b2c, w3c, b3s = params
    B = x.shape[0]
    assert x.shape == (B, STATE_DIM)

    def _round_up(a, m):
        return ((a + m - 1) // m) * m

    tile_m = _round_up(max(tile_m, 128), 128)
    tm = min(tile_m, _round_up(B, 128))
    b_pad = _round_up(B, tm)
    # v7x megacore: for large batches keep >= ~4 grid steps per TensorCore so the
    # x/out double-buffering has work to overlap, but never drop below 1024 rows/step
    # (per-step overhead ~0.35 us dominates below that).
    while tm > 1024 and b_pad // tm < 8:
        tm = max(1024, _round_up(tm // 2, 128))
        b_pad = _round_up(B, tm)
    grid = (b_pad // tm,)

    # Lane-dense layout: batch on lanes.  Transpose in the wrapper; padding rows is
    # harmless (rows independent, sliced off below).
    x_t = jnp.transpose(x)                                      # (STATE_DIM, B)
    if b_pad != B:
        x_t = jnp.pad(x_t, ((0, 0), (0, b_pad - B)))

    # Weights/biases: constant index_map -> stay VMEM-resident across all grid steps.
    # (pl.Buffered(1) would also drop the spare buffer, but these operands total
    #  < 50 KiB, so the default buffering is irrelevant and compiles everywhere.)
    pinned = lambda a: pl.BlockSpec(a.shape, lambda i: (0,) * a.ndim)

    flops = 2 * B * (STATE_DIM * HIDDEN + HIDDEN * HIDDEN + HIDDEN * ACTION_DIM)
    bytes_accessed = int(
        x_t.size * x_t.dtype.itemsize + b_pad * ACTION_DIM * 4
        + sum(int(a.size) * a.dtype.itemsize for a in (w1t, b1c, w2t, b2c, w3c, b3s)))

    out = pl.pallas_call(
        _mlp_kernel,
        out_shape=jax.ShapeDtypeStruct((ACTION_DIM, b_pad), jnp.float32),
        grid=grid,
        in_specs=[
            pl.BlockSpec((STATE_DIM, tm), lambda i: (0, i)),    # x: streamed, lane-dense
            pinned(w1t),
            pinned(b1c),
            pinned(w2t),
            pinned(b2c),
            pinned(w3c),
            pl.BlockSpec(memory_space=pltpu.MemorySpace.SMEM),  # b3 scalar
        ],
        out_specs=pl.BlockSpec((ACTION_DIM, tm), lambda i: (0, i)),  # lane-dense row
        compiler_params=pltpu.CompilerParams(
            dimension_semantics=("parallel",),   # batch tiles shard across v7x's 2 TCs
        ),
        cost_estimate=pl.CostEstimate(flops=flops, transcendentals=0,
                                      bytes_accessed=bytes_accessed),
    )(x_t, w1t, b1c, w2t, b2c, w3c, b3s)

    return jnp.reshape(out[0, :B], (B, ACTION_DIM))


def init_params(key):
    """Deterministic init mimicking torch.nn.Linear default (U[-1/sqrt(fan_in), ...])."""
    ks = jax.random.split(key, 6)

    def linear(kw, kb, fan_in, fan_out):
        bound = 1.0 / math.sqrt(fan_in)
        w = jax.random.uniform(kw, (fan_in, fan_out), jnp.float32, -bound, bound)
        b = jax.random.uniform(kb, (1, fan_out), jnp.float32, -bound, bound)
        return w, b

    w1, b1 = linear(ks[0], ks[1], STATE_DIM, HIDDEN)
    w2, b2 = linear(ks[2], ks[3], HIDDEN, HIDDEN)
    w3, b3 = linear(ks[4], ks[5], HIDDEN, ACTION_DIM)
    return w1, b1, w2, b2, w3, b3


if __name__ == "__main__":
    key = jax.random.PRNGKey(0)
    pkey, xkey_small, xkey_big = jax.random.split(key, 3)

    w1, b1, w2, b2, w3, b3 = init_params(pkey)

    def ref_forward(xin):
        h1 = jnp.maximum(xin @ w1 + b1, 0.0)
        h2 = jnp.maximum(h1 @ w2 + b2, 0.0)
        return h2 @ w3 + b3

    # Exact-path check (f32 MXU operands + f32 elementwise), small batch of states.
    params_f32 = prepare_params(w1, b1, w2, b2, w3, b3,
                                matmul_dtype=jnp.float32,
                                activation_dtype=jnp.float32)
    x_small = jax.random.normal(xkey_small, (8, STATE_DIM), dtype=jnp.float32)
    out_small = jax.block_until_ready(
        cross_entropy_agent_forward(x_small, params_f32))
    assert out_small.shape == (8, ACTION_DIM)
    assert jnp.allclose(out_small, ref_forward(x_small), atol=1e-4, rtol=1e-4)

    # Fast path (bf16 MXU operands + bf16 elementwise: the v6e/v7x configuration) on a
    # larger, non-tile-multiple batch: exercises batch tiling + padding + lane-dense
    # output writeback.  bf16 activations widen the error vs the f32 reference.
    params_bf16 = prepare_params(w1, b1, w2, b2, w3, b3,
                                 matmul_dtype=jnp.bfloat16,
                                 activation_dtype=jnp.bfloat16)
    x_big = jax.random.normal(xkey_big, (1000, STATE_DIM), dtype=jnp.float32)
    out_big = jax.block_until_ready(
        cross_entropy_agent_forward(x_big, params_bf16, tile_m=1024))
    assert out_big.shape == (1000, ACTION_DIM)
    assert jnp.allclose(out_big, ref_forward(x_big), atol=1e-1, rtol=1e-1)

    print("KERNEL_OK")
</pallas_src>

<mosaic_0001>
module attributes {stable_mosaic.version = 11 : i64} {
  func.func @_mlp_kernel(%arg0: i32, %arg1: memref<2x128xf32, #tpu.memory_space<vmem>>, %arg2: memref<128x2xf32, #tpu.memory_space<vmem>>, %arg3: memref<128x1xf32, #tpu.memory_space<vmem>>, %arg4: memref<128x128xf32, #tpu.memory_space<vmem>>, %arg5: memref<128x1xf32, #tpu.memory_space<vmem>>, %arg6: memref<128x1xf32, #tpu.memory_space<vmem>>, %arg7: memref<1xf32, #tpu.memory_space<smem>>, %arg8: memref<1x128xf32, #tpu.memory_space<vmem>>) attributes {dimension_semantics = [#tpu.dimension_semantics<parallel>], iteration_bounds = array<i64: 1>, scalar_prefetch = 0 : i64, scratch_operands = 0 : i64, tpu.core_type = #tpu.core_type<tc>, window_params = [{transform_indices = @transform_0, window_bounds = array<i64: 2, 128>}, {pipeline_mode = #tpu.pipeline_mode<synchronous>, transform_indices = @transform_1, window_bounds = array<i64: 128, 2>}, {pipeline_mode = #tpu.pipeline_mode<synchronous>, transform_indices = @transform_2, window_bounds = array<i64: 128, 1>}, {pipeline_mode = #tpu.pipeline_mode<synchronous>, transform_indices = @transform_3, window_bounds = array<i64: 128, 128>}, {pipeline_mode = #tpu.pipeline_mode<synchronous>, transform_indices = @transform_4, window_bounds = array<i64: 128, 1>}, {pipeline_mode = #tpu.pipeline_mode<synchronous>, transform_indices = @transform_5, window_bounds = array<i64: 128, 1>}, {transform_indices = @transform_6, window_bounds = array<i64: 1>}, {transform_indices = @transform_7, window_bounds = array<i64: 1, 128>}]} {
    %c0 = arith.constant 0 : index
    %c0_0 = arith.constant 0 : index
    %0 = vector.load %arg1[%c0, %c0_0] : memref<2x128xf32, #tpu.memory_space<vmem>>, vector<2x128xf32>
    %c0_1 = arith.constant 0 : index
    %c0_2 = arith.constant 0 : index
    %1 = vector.load %arg2[%c0_1, %c0_2] : memref<128x2xf32, #tpu.memory_space<vmem>>, vector<128x2xf32>
    %2 = vector.extract_strided_slice %1 {offsets = [0, 0], sizes = [128, 1], strides = [1, 1]} : vector<128x2xf32> to vector<128x1xf32>
    %3 = vector.extract_strided_slice %0 {offsets = [0, 0], sizes = [1, 128], strides = [1, 1]} : vector<2x128xf32> to vector<1x128xf32>
    %4 = vector.broadcast %2 : vector<128x1xf32> to vector<128x128xf32>
    %5 = vector.broadcast %3 : vector<1x128xf32> to vector<128x128xf32>
    %6 = arith.mulf %4, %5 : vector<128x128xf32>
    %7 = vector.extract_strided_slice %1 {offsets = [0, 1], sizes = [128, 1], strides = [1, 1]} : vector<128x2xf32> to vector<128x1xf32>
    %8 = vector.extract_strided_slice %0 {offsets = [1, 0], sizes = [1, 128], strides = [1, 1]} : vector<2x128xf32> to vector<1x128xf32>
    %9 = vector.broadcast %7 : vector<128x1xf32> to vector<128x128xf32>
    %10 = vector.broadcast %8 : vector<1x128xf32> to vector<128x128xf32>
    %11 = arith.mulf %9, %10 : vector<128x128xf32>
    %12 = arith.addf %6, %11 : vector<128x128xf32>
    %c0_3 = arith.constant 0 : index
    %c0_4 = arith.constant 0 : index
    %13 = vector.load %arg3[%c0_3, %c0_4] : memref<128x1xf32, #tpu.memory_space<vmem>>, vector<128x1xf32>
    %14 = vector.broadcast %13 : vector<128x1xf32> to vector<128x128xf32>
    %15 = arith.addf %12, %14 : vector<128x128xf32>
    %cst = arith.constant 0.000000e+00 : f32
    %16 = vector.broadcast %cst : f32 to vector<128x128xf32>
    %17 = arith.maximumf %15, %16 : vector<128x128xf32>
    %c0_5 = arith.constant 0 : index
    %c0_6 = arith.constant 0 : index
    %18 = vector.load %arg4[%c0_5, %c0_6] : memref<128x128xf32, #tpu.memory_space<vmem>>, vector<128x128xf32>
    %cst_7 = arith.constant dense<0.000000e+00> : vector<128x128xf32>
    %19 = tpu.matmul %18, %17, %cst_7 {dimension_numbers = #tpu.dot_dimension_numbers<[1], [0], [0], [1], [0, 0, 1, 1], [], []>} : vector<128x128xf32>, vector<128x128xf32>, vector<128x128xf32> -> vector<128x128xf32>
    %c0_8 = arith.constant 0 : index
    %c0_9 = arith.constant 0 : index
    %20 = vector.load %arg5[%c0_8, %c0_9] : memref<128x1xf32, #tpu.memory_space<vmem>>, vector<128x1xf32>
    %21 = vector.broadcast %20 : vector<128x1xf32> to vector<128x128xf32>
    %22 = arith.addf %19, %21 : vector<128x128xf32>
    %cst_10 = arith.constant 0.000000e+00 : f32
    %23 = vector.broadcast %cst_10 : f32 to vector<128x128xf32>
    %24 = arith.maximumf %22, %23 : vector<128x128xf32>
    %c0_11 = arith.constant 0 : index
    %c0_12 = arith.constant 0 : index
    %25 = vector.load %arg6[%c0_11, %c0_12] : memref<128x1xf32, #tpu.memory_space<vmem>>, vector<128x1xf32>
    %26 = vector.broadcast %25 : vector<128x1xf32> to vector<128x128xf32>
    %27 = arith.mulf %24, %26 : vector<128x128xf32>
    %cst_13 = arith.constant dense<0.000000e+00> : vector<128xf32>
    %28 = vector.multi_reduction <add>, %27, %cst_13 [0] : vector<128x128xf32> to vector<128xf32>
    %29 = vector.shape_cast %28 : vector<128xf32> to vector<1x128xf32>
    %c0_14 = arith.constant 0 : index
    %30 = memref.load %arg7[%c0_14] : memref<1xf32, #tpu.memory_space<smem>>
    %31 = vector.broadcast %30 : f32 to vector<1x128xf32>
    %32 = arith.addf %29, %31 : vector<1x128xf32>
    %c0_15 = arith.constant 0 : index
    %c0_16 = arith.constant 0 : index
    %33 = vector.load %arg8[%c0_15, %c0_16] : memref<1x128xf32, #tpu.memory_space<vmem>>, vector<1x128xf32>
    tpu.vector_store %arg8[%c0_15, %c0_16], %32 {strides = array<i32>} : memref<1x128xf32, #tpu.memory_space<vmem>>, vector<1x128xf32>,
    return
  }
  func.func @transform_0(%arg0: i32) -> (i32, i32) {
    %c0_i32 = arith.constant 0 : i32
    %c0_i32_0 = arith.constant 0 : i32
    return %c0_i32, %arg0 : i32, i32
  }
  func.func @transform_1(%arg0: i32) -> (i32, i32) {
    %c0_i32 = arith.constant 0 : i32
    %c0_i32_0 = arith.constant 0 : i32
    %c0_i32_1 = arith.constant 0 : i32
    return %c0_i32, %c0_i32_0 : i32, i32
  }
  func.func @transform_2(%arg0: i32) -> (i32, i32) {
    %c0_i32 = arith.constant 0 : i32
    %c0_i32_0 = arith.constant 0 : i32
    %c0_i32_1 = arith.constant 0 : i32
    return %c0_i32, %c0_i32_0 : i32, i32
  }
  func.func @transform_3(%arg0: i32) -> (i32, i32) {
    %c0_i32 = arith.constant 0 : i32
    %c0_i32_0 = arith.constant 0 : i32
    %c0_i32_1 = arith.constant 0 : i32
    return %c0_i32, %c0_i32_0 : i32, i32
  }
  func.func @transform_4(%arg0: i32) -> (i32, i32) {
    %c0_i32 = arith.constant 0 : i32
    %c0_i32_0 = arith.constant 0 : i32
    %c0_i32_1 = arith.constant 0 : i32
    return %c0_i32, %c0_i32_0 : i32, i32
  }
  func.func @transform_5(%arg0: i32) -> (i32, i32) {
    %c0_i32 = arith.constant 0 : i32
    %c0_i32_0 = arith.constant 0 : i32
    %c0_i32_1 = arith.constant 0 : i32
    return %c0_i32, %c0_i32_0 : i32, i32
  }
  func.func @transform_6(%arg0: i32) -> i32 {
    %c0_i32 = arith.constant 0 : i32
    %c0_i32_0 = arith.constant 0 : i32
    return %c0_i32 : i32
  }
  func.func @transform_7(%arg0: i32) -> (i32, i32) {
    %c0_i32 = arith.constant 0 : i32
    %c0_i32_0 = arith.constant 0 : i32
    return %c0_i32, %arg0 : i32, i32
  }
}

</mosaic_0001>

<bundles_post_ra>
// kernel: tpu_custom_call.1
= control target key start
LH: loop header
LB: loop body
LE: loop exit
PB: predicated region body
PF: predicated region fallthrough
CT: control target
= control target key end

     0   :  { %v978_v2 = vmov 1   ;;  %v979_v7 = vmov 0   ;;  %s1359_s0 = inlined_call_operand.vmem [shape: f32[2,128], index: 0, kind: input, shape index: {}]   ;;  %s1360_s1 = inlined_call_operand.vmem [shape: f32[128,2], index: 1, kind: input, shape index: {}]   ;;  %s1361_s2 = inlined_call_operand.vmem [shape: f32[128,1], index: 2, kind: input, shape index: {}]   ;;  %s1362_s3 = inlined_call_operand.vmem [shape: f32[128,128], index: 3, kind: input, shape index: {}]   ;;  %s1363_s4 = inlined_call_operand.vmem [shape: f32[128,1], index: 4, kind: input, shape index: {}]   ;;  %s1364_s5 = inlined_call_operand.vmem [shape: f32[128,1], index: 5, kind: input, shape index: {}]   ;;  %s1365_s6 = inlined_call_operand.<no memory space> [shape: f32[1], index: 6, kind: input, shape index: {}]   ;;  %s1366_s7 = inlined_call_operand.hbm [shape: f32[1,128], index: 7, kind: output, shape index: {}]  }
   0x1   :  { %v31_v0 = vld [vmem:[%s1360_s1 + $0x10] sm:$0xff]  ;;  %v29_v1 = vld [vmem:[%s1360_s1] sm:$0xff]  ;;  %938 = vset.pattern.permute.xlu0 %v978_v2  ;;  %936 = vset.pattern.permute.xlu1 %v978_v2  ;;  %v30_v4 = vld [vmem:[%s1360_s1 + $0x8] sm:$0xff] }
   0x2   :  { %154 = vperm.xlu0 %938, %v31_v0   ;;  %146 = vperm.xlu1 %936, %v29_v1   ;;  %v33_v3 = vld [vmem:[%s1360_s1 + $0x20] sm:$0xff]  ;;  %v35_v5 = vld [vmem:[%s1360_s1 + $0x30] sm:$0xff]  ;;  %v32_v6 = vld [vmem:[%s1360_s1 + $0x18] sm:$0xff] }
   0x3   :  { %v37_v8 = vld [vmem:[%s1360_s1 + $0x40] sm:$0xff]  ;;  %v39_v9 = vld [vmem:[%s1360_s1 + $0x50] sm:$0xff] }
   0x6   :  { %162 = vperm.xlu0 %938, %v33_v3   ;;  %150 = vperm.xlu1 %936, %v30_v4  }
   0xa   :  { %170 = vperm.xlu0 %938, %v35_v5   ;;  %937 = vset.pattern.permute.xlu1 %v979_v7 }
   0xb   :  { %62 = vperm.xlu1 %937, %v32_v6  }
   0xe   :  { %178 = vperm.xlu0 %938, %v37_v8  }
   0xf   :  { %939 = vset.pattern.permute.xlu1 %v978_v2 }
  0x10   :  { %158 = vperm.xlu1 %939, %v32_v6  }
  0x11   :  { %13 = vsyncpa [#allocation4], 0  ;;  %v245_v10 = vld [vmem:[%s1361_s2] sm:$0xff]  ;;  %v1062_v12 = vld [vmem:[%s1360_s1 + $0x70] sm:$0xff]  ;;  %s980_s13 = smov [#allocation3]  }
  0x12   :  { %186 = vperm.xlu0 %938, %v39_v9   ;;  %v1055_v11 = vld [vmem:[%s1360_s1 + $0x60] sm:$0xff]  ;;  %v34_v13 = vld [vmem:[%s1360_s1 + $0x28] sm:$0xff]  ;;  %v247_v14 = vld [vmem:[%s1361_s2 + $0x10] sm:$0xff]  ;;  %s789_s14 = sshll.u32 %s980_s13, 4  ;;  %s790_s14 = int_to_ptr.vmem [resolvable:$true] %s789_s14 }
  0x13   :  { %v246_v15 = vld [vmem:[%s1361_s2 + $0x8] sm:$0xff]  ;;  %v248_v16 = vld [vmem:[%s1361_s2 + $0x18] sm:$0xff]  ;;  %v249_v20 = vld [vmem:[%s1361_s2 + $0x20] sm:$0xff]  ;;  %s954_s15 = scalar_lea.vmem %s790_s14, 16  ;;  %s958_s16 = scalar_lea.vmem %s790_s14, 32 }
  0x14   :  { %940 = vset.pattern.permute.xlu1 %v979_v7  ;;  %v36_v17 = vld [vmem:[%s1360_s1 + $0x38] sm:$0xff]  ;;  %v250_v18 = vld [vmem:[%s1361_s2 + $0x28] sm:$0xff]  ;;  %v389_v25 = vld [vmem:[%s1363_s4] sm:$0xff]  ;;  %p955_p0 = scmp.ne.s32.totalorder %s790_s14, %s954_s15  ;;  %p959_p1 = scmp.lt.s32.totalorder %s790_s14, %s790_s14 }
  0x15   :  { %263 = vperm.xlu1 %940, %v245_v10   ;;  %v252_v19 = vld [vmem:[%s1361_s2 + $0x38] sm:$0xff]  ;;  %v254_v21 = vld [vmem:[%s1361_s2 + $0x48] sm:$0xff]  ;;  %v391_v26 = vld [vmem:[%s1363_s4 + $0x10] sm:$0xff]  ;;  %p960_p2 = scmp.lt.s32.totalorder %s958_s16, %s954_s15 }
  0x16   :  { %194 = vperm.xlu0 %938, %v1055_v11   ;;  %v256_v22 = vld [vmem:[%s1361_s2 + $0x58] sm:$0xff]  ;;  %v38_v23 = vld [vmem:[%s1360_s1 + $0x48] sm:$0xff]  ;;  %v251_v27 = vld [vmem:[%s1361_s2 + $0x30] sm:$0xff] }
  0x17   :  { %v258_v24 = vld [vmem:[%s1361_s2 + $0x68] sm:$0xff]  ;;  %v646_v28 = vld [vmem:[%s1364_s5] sm:$0xff]  ;;  %v40_v30 = vld [vmem:[%s1360_s1 + $0x58] sm:$0xff]  ;;  %p961_p3 = por %p960_p2, %p959_p1 }
  0x18   :  { %v393_v29 = vld [vmem:[%s1363_s4 + $0x20] sm:$0xff]  ;;  %v394_v31 = vld [vmem:[%s1363_s4 + $0x28] sm:$0xff]  ;;  %v395_v32 = vld [vmem:[%s1363_s4 + $0x30] sm:$0xff] }
  0x19   :  { %67 = vperm.xlu1 %940, %v33_v3   ;;  %v253_v33 = vld [vmem:[%s1361_s2 + $0x40] sm:$0xff]  ;;  %v396_v34 = vld [vmem:[%s1363_s4 + $0x38] sm:$0xff]  ;;  %v42_v36 = vld [vmem:[%s1360_s1 + $0x68] sm:$0xff]  ;;  %p962_p4 = pnand %p961_p3, %p955_p0 }
  0x1a   :  { %202 = vperm.xlu0 %938, %v1062_v12   ;;  %v397_v35 = vld [vmem:[%s1363_s4 + $0x40] sm:$0xff]  ;;  %v398_v37 = vld [vmem:[%s1363_s4 + $0x48] sm:$0xff]  ;;  %v399_v38 = vld [vmem:[%s1363_s4 + $0x50] sm:$0xff] }
  0x1b   :  { %v400_v39 = vld [vmem:[%s1363_s4 + $0x58] sm:$0xff]  ;;  %v255_v40 = vld [vmem:[%s1361_s2 + $0x50] sm:$0xff]  ;;  %v401_v41 = vld [vmem:[%s1363_s4 + $0x60] sm:$0xff] }
  0x1c   :  { %v402_v42 = vld [vmem:[%s1363_s4 + $0x68] sm:$0xff]  ;;  %v44_v43 = vld [vmem:[%s1360_s1 + $0x78] sm:$0xff]  ;;  %v403_v44 = vld [vmem:[%s1363_s4 + $0x70] sm:$0xff] }
  0x1d   :  { %72 = vperm.xlu1 %940, %v34_v13   ;;  %v404_v45 = vld [vmem:[%s1363_s4 + $0x78] sm:$0xff]  ;;  %v257_v46 = vld [vmem:[%s1361_s2 + $0x60] sm:$0xff]  ;;  %v660_v47 = vld [vmem:[%s1364_s5 + $0x70] sm:$0xff] }
  0x1e   :  { %951 = vset.pattern.permute.xlu0 %v979_v7  ;;  %v259_v50 = vld [vmem:[%s1361_s2 + $0x70] sm:$0xff]  ;;  %v260_v53 = vld [vmem:[%s1361_s2 + $0x78] sm:$0xff]  ;;  %v390_v56 = vld [vmem:[%s1363_s4 + $0x8] sm:$0xff] }
  0x1f   :  { %47 = vperm.xlu0 %951, %v29_v1   ;;  %v392_v58 = vld [vmem:[%s1363_s4 + $0x18] sm:$0xff]  ;;  %v373_v60 = vld [vmem:[%s1362_s3] sm:$0xff]  ;;  %v647_v63 = vld [vmem:[%s1364_s5 + $0x8] sm:$0xff] }
  0x20   :  { %v381_v61 = vld [vmem:[%s1362_s3 + $0x40] sm:$0xff]  ;;  %861 = vmatprep.mubr.f32.mxu0 %v373_v60  ;;  %v648_v3 = vld [vmem:[%s1364_s5 + $0x10] sm:$0xff] }
  0x21   :  { %941 = vset.pattern.permute.xlu1 %v978_v2  ;;  %873 = vmatprep.mubr.f32.mxu1 %v381_v61  ;;  %v28_v10 = vld [vmem:[%s1359_s0] sm:$0x3]  ;;  %v656_v61 = vld [vmem:[%s1364_s5 + $0x50] sm:$0xff] }
  0x22   :  { %166 = vperm.xlu1 %941, %v34_v13   ;;  %v650_v13 = vld [vmem:[%s1364_s5 + $0x20] sm:$0xff] }
  0x23   :  { %52 = vperm.xlu0 %951, %v30_v4  }
  0x26   :  { %942 = vset.pattern.permute.xlu1 %v979_v7 }
  0x27   :  { %57 = vperm.xlu0 %951, %v31_v0   ;;  %273 = vperm.xlu1 %942, %v247_v14   ;;  %v125_v0 = vlaneseq }
  0x29   :  { %v126_v4 = vshrl.u32 %v125_v0, 7 }
  0x2b   :  { %268 = vperm.xlu0 %951, %v246_v15   ;;  %77 = vperm.xlu1 %942, %v35_v5  }
  0x2f   :  { %278 = vperm.xlu0 %951, %v248_v16   ;;  %82 = vperm.xlu1 %942, %v36_v17  }
  0x33   :  { %288 = vperm.xlu0 %951, %v250_v18   ;;  %943 = vset.pattern.permute.xlu1 %v978_v2 }
  0x34   :  { %174 = vperm.xlu1 %943, %v36_v17  }
  0x37   :  { %298 = vperm.xlu0 %951, %v252_v19   ;;  %v651_v19 = vld [vmem:[%s1364_s5 + $0x28] sm:$0xff] }
  0x38   :  { %944 = vset.pattern.permute.xlu1 %v979_v7 }
  0x39   :  { %283 = vperm.xlu1 %944, %v249_v20  }
  0x3b   :  { %308 = vperm.xlu0 %951, %v254_v21  }
  0x3d   :  { %87 = vperm.xlu1 %944, %v37_v8   ;;  %v211_v8 = vsub.s32 1, %v126_v4 }
  0x3f   :  { %318 = vperm.xlu0 %951, %v256_v22   ;;  %v1230_v14 = vrot.slane %v28_v10, %v211_v8 }
  0x41   :  { %92 = vperm.xlu1 %944, %v38_v23  }
  0x43   :  { %328 = vperm.xlu0 %951, %v258_v24  }
  0x45   :  { %945 = vset.pattern.permute.xlu1 %v978_v2 }
  0x46   :  { %182 = vperm.xlu1 %945, %v38_v23  }
  0x47   :  { %407 = vperm.xlu0 %951, %v389_v25  }
  0x4a   :  { %946 = vset.pattern.permute.xlu1 %v979_v7 }
  0x4b   :  { %417 = vperm.xlu0 %951, %v391_v26   ;;  %293 = vperm.xlu1 %946, %v251_v27   ;;  %v652_v26 = vld [vmem:[%s1364_s5 + $0x30] sm:$0xff] }
  0x4f   :  { %664 = vperm.xlu0 %951, %v646_v28   ;;  %97 = vperm.xlu1 %946, %v39_v9   ;;  %v127_v9 = vsub.s32 0, %v126_v4 }
  0x51   :  { %v1232_v15 = vrot.slane %v28_v10, %v127_v9  ;;  %v658_v9 = vld [vmem:[%s1364_s5 + $0x60] sm:$0xff] }
  0x53   :  { %427 = vperm.xlu0 %951, %v393_v29   ;;  %102 = vperm.xlu1 %946, %v40_v30  }
  0x57   :  { %432 = vperm.xlu0 %951, %v394_v31   ;;  %947 = vset.pattern.permute.xlu1 %v978_v2 }
  0x58   :  { %190 = vperm.xlu1 %947, %v40_v30  }
  0x5b   :  { %437 = vperm.xlu0 %951, %v395_v32  }
  0x5c   :  { %948 = vset.pattern.permute.xlu1 %v979_v7 }
  0x5d   :  { %303 = vperm.xlu1 %948, %v253_v33  }
  0x5f   :  { %442 = vperm.xlu0 %951, %v396_v34  }
  0x61   :  { %107 = vperm.xlu1 %948, %v1055_v11  }
  0x63   :  { %447 = vperm.xlu0 %951, %v397_v35   ;;  %v653_v35 = vld [vmem:[%s1364_s5 + $0x38] sm:$0xff] }
  0x65   :  { %112 = vperm.xlu1 %948, %v42_v36  }
  0x67   :  { %452 = vperm.xlu0 %951, %v398_v37  }
  0x69   :  { %949 = vset.pattern.permute.xlu1 %v978_v2 }
  0x6a   :  { %198 = vperm.xlu1 %949, %v42_v36  }
  0x6b   :  { %457 = vperm.xlu0 %951, %v399_v38  }
  0x6e   :  { %950 = vset.pattern.permute.xlu1 %v979_v7 }
  0x6f   :  { %462 = vperm.xlu0 %951, %v400_v39   ;;  %313 = vperm.xlu1 %950, %v255_v40  }
  0x73   :  { %467 = vperm.xlu0 %951, %v401_v41   ;;  %117 = vperm.xlu1 %950, %v1062_v12  }
  0x77   :  { %472 = vperm.xlu0 %951, %v402_v42   ;;  %122 = vperm.xlu1 %950, %v44_v43  }
  0x7b   :  { %477 = vperm.xlu0 %951, %v403_v44   ;;  %952 = vset.pattern.permute.xlu1 %v978_v2  ;;  %v654_v44 = vld [vmem:[%s1364_s5 + $0x40] sm:$0xff] }
  0x7c   :  { %206 = vperm.xlu1 %952, %v44_v43  }
  0x7f   :  { %482 = vperm.xlu0 %951, %v404_v45  }
  0x80   :  { %953 = vset.pattern.permute.xlu1 %v979_v7  ;;  %v649_v7 = vld [vmem:[%s1364_s5 + $0x18] sm:$0xff] }
  0x81   :  { %323 = vperm.xlu1 %953, %v257_v46   ;;  %v147_v48 = vpop.permute.xlu1 %146  ;;  %v155_v49 = vpop.permute.xlu0 %154 }
  0x82   :  { %v213_v20 = vmul.f32 %v1230_v14, %v147_v48  ;;  %v215_v21 = vmul.f32 %v1230_v14, %v155_v49 }
  0x83   :  { %734 = vperm.xlu0 %951, %v660_v47  }
  0x85   :  { %333 = vperm.xlu1 %953, %v259_v50   ;;  %v151_v51 = vpop.permute.xlu1 %150  ;;  %v1188_v52 = vpop.permute.xlu0 %162  ;;  %v655_v50 = vld [vmem:[%s1364_s5 + $0x48] sm:$0xff] }
  0x86   :  { %v214_v27 = vmul.f32 %v1230_v14, %v151_v51  ;;  %v217_v51 = vmul.f32 %v1230_v14, %v1188_v52 }
  0x89   :  { %338 = vperm.xlu1 %953, %v260_v53   ;;  %v1193_v54 = vpop.permute.xlu0 %170 }
  0x8a   :  { %v63_v55 = vpop.permute.xlu1 %62 }
  0x8b   :  { %v132_v36 = vmul.f32 %v1232_v15, %v63_v55 }
  0x8d   :  { %412 = vperm.xlu1 %953, %v390_v56   ;;  %v1198_v57 = vpop.permute.xlu0 %178 }
  0x8f   :  { %v159_v59 = vpop.permute.xlu1 %158 }
  0x90   :  { %v216_v29 = vmul.f32 %v1230_v14, %v159_v59 }
  0x91   :  { %422 = vperm.xlu1 %953, %v392_v58   ;;  %v1209_v62 = vpop.permute.xlu0 %186 }
  0x92   :  { %v232_v41 = vadd.f32 %v216_v29, %v132_v36 }
  0x94   :  { %v264_v1 = vpop.permute.xlu1 %263 }
  0x95   :  { %669 = vperm.xlu1 %953, %v647_v63   ;;  %v1214_v2 = vpop.permute.xlu0 %194 }
  0x98   :  { %v68_v5 = vpop.permute.xlu1 %67 }
  0x99   :  { %674 = vperm.xlu1 %953, %v648_v3   ;;  %v1219_v6 = vpop.permute.xlu0 %202  ;;  %v133_v53 = vmul.f32 %v1232_v15, %v68_v5  ;;  %v657_v3 = vld [vmem:[%s1364_s5 + $0x58] sm:$0xff] }
  0x9b   :  { %v233_v52 = vadd.f32 %v217_v51, %v133_v53 }
  0x9c   :  { %v73_v11 = vpop.permute.xlu1 %72 }
  0x9d   :  { %679 = vperm.xlu1 %953, %v649_v7   ;;  %v134_v55 = vmul.f32 %v1232_v15, %v73_v11 }
  0x9e   :  { %v48_v12 = vpop.permute.xlu0 %47 }
  0x9f   :  { %v129_v16 = vmul.f32 %v1232_v15, %v48_v12  ;;  %v659_v12 = vld [vmem:[%s1364_s5 + $0x68] sm:$0xff] }
  0xa1   :  { %684 = vperm.xlu1 %953, %v650_v13   ;;  %v167_v17 = vpop.permute.xlu1 %166  ;;  %v229_v22 = vadd.f32 %v213_v20, %v129_v16  ;;  %v219_v16 = vmul.f32 %v1230_v14, %v1193_v54 }
  0xa2   :  { %v53_v18 = vpop.permute.xlu0 %52  ;;  %v218_v47 = vmul.f32 %v1230_v14, %v167_v17 }
  0xa3   :  { %v130_v23 = vmul.f32 %v1232_v15, %v53_v18  ;;  %v341_v30 = vadd.f32 %v264_v1, %v229_v22 }
  0xa4   :  { %v234_v60 = vadd.f32 %v218_v47, %v134_v55 }
  0xa5   :  { %689 = vperm.xlu1 %953, %v651_v19   ;;  %v230_v32 = vadd.f32 %v214_v27, %v130_v23  ;;  %v357_v39 = vmax.f32 %v341_v30, 0.0 }
  0xa6   :  { %v58_v24 = vpop.permute.xlu0 %57  ;;  %v274_v25 = vpop.permute.xlu1 %273 }
  0xa7   :  { %v131_v28 = vmul.f32 %v1232_v15, %v58_v24 }
  0xa9   :  { %v231_v31 = vadd.f32 %v215_v21, %v131_v28  ;;  %694 = vperm.xlu1 %953, %v652_v26   ;;  %v661_v21 = vld [vmem:[%s1364_s5 + $0x78] sm:$0xff] }
  0xaa   :  { %v269_v33 = vpop.permute.xlu0 %268  ;;  %v78_v34 = vpop.permute.xlu1 %77 }
  0xab   :  { %v342_v37 = vadd.f32 %v269_v33, %v230_v32  ;;  %v343_v38 = vadd.f32 %v274_v25, %v231_v31  ;;  %v135_v17 = vmul.f32 %v1232_v15, %v78_v34  ;;  %v221_v32 = vmul.f32 %v1230_v14, %v1198_v57 }
  0xad   :  { %v358_v40 = vmax.f32 %v342_v37, 0.0  ;;  %699 = vperm.xlu1 %953, %v653_v35   ;;  %v359_v48 = vmax.f32 %v343_v38, 0.0  ;;  %v235_v23 = vadd.f32 %v219_v16, %v135_v17 }
  0xae   :  { %v279_v42 = vpop.permute.xlu0 %278  ;;  %v83_v43 = vpop.permute.xlu1 %82 }
  0xaf   :  { %v885_v45 = vpack.c.bf16 %v358_v40, %v357_v39  ;;  %v344_v46 = vadd.f32 %v279_v42, %v232_v41  ;;  %v136_v13 = vmul.f32 %v1232_v15, %v83_v43 }
  0xb1   :  { %v360_v49 = vmax.f32 %v344_v46, 0.0  ;;  %704 = vperm.xlu1 %953, %v654_v44   ;;  %886 = vmatprep.subr.bf16.mxu0 %v885_v45 }
  0xb2   :  { %917 = vmatprep.subr.bf16.mxu1 %v885_v45  ;;  %888 = vmatpush3.bf16.msra.mxu0 %v885_v45  ;;  %v289_v59 = vpop.permute.xlu0 %288 }
  0xb3   :  { %v889_v56 = vpack.c.bf16 %v360_v49, %v359_v48  ;;  %925 = vmatpush3.bf16.msra.mxu1 %v885_v45  ;;  %v175_v58 = vpop.permute.xlu1 %174  ;;  %v346_v63 = vadd.f32 %v289_v59, %v234_v60 }
  0xb4   :  { %v220_v11 = vmul.f32 %v1230_v14, %v175_v58 }
  0xb5   :  { %709 = vperm.xlu1 %953, %v655_v50   ;;  %890 = vmatprep.subr.bf16.mxu0 %v889_v56  ;;  %v362_v4 = vmax.f32 %v346_v63, 0.0  ;;  %v223_v50 = vmul.f32 %v1230_v14, %v1209_v62 }
  0xb6   :  { %918 = vmatprep.subr.bf16.mxu1 %v889_v56  ;;  %892 = vmatpush3.bf16.msra.mxu0 %v889_v56  ;;  %v236_v18 = vadd.f32 %v220_v11, %v136_v13  ;;  %v299_v20 = vpop.permute.xlu0 %298  ;;  %v227_v13 = vmul.f32 %v1230_v14, %v1219_v6 }
  0xb7   :  { %926 = vmatpush3.bf16.msra.mxu1 %v889_v56 }
  0xb8   :  { %v284_v0 = vpop.permute.xlu1 %283  ;;  %v348_v22 = vadd.f32 %v299_v20, %v236_v18 }
  0xb9   :  { %v345_v1 = vadd.f32 %v284_v0, %v233_v52  ;;  %714 = vperm.xlu1 %953, %v656_v61  }
  0xba   :  { %v364_v26 = vmax.f32 %v348_v22, 0.0  ;;  %v309_v36 = vpop.permute.xlu0 %308 }
  0xbb   :  { %v361_v5 = vmax.f32 %v345_v1, 0.0 }
  0xbc   :  { %v88_v7 = vpop.permute.xlu1 %87 }
  0xbd   :  { %v893_v8 = vpack.c.bf16 %v362_v4, %v361_v5  ;;  %719 = vperm.xlu1 %953, %v657_v3   ;;  %v137_v33 = vmul.f32 %v1232_v15, %v88_v7  ;;  %v225_v5 = vmul.f32 %v1230_v14, %v1214_v2 }
  0xbe   :  { %v319_v51 = vpop.permute.xlu0 %318 }
  0xbf   :  { %894 = vmatprep.subr.bf16.mxu0 %v893_v8  ;;  %919 = vmatprep.subr.bf16.mxu1 %v893_v8  ;;  %v237_v38 = vadd.f32 %v221_v32, %v137_v33  ;;  %v385_v32 = vld [vmem:[%s1362_s3 + $0x60] sm:$0xff]  ;;  %v378_v33 = vld [vmem:[%s1362_s3 + $0x28] sm:$0xff] }
  0xc0   :  { %v93_v10 = vpop.permute.xlu1 %92  ;;  %896 = vmatpush3.bf16.msra.mxu0 %v893_v8  ;;  %927 = vmatpush3.bf16.msra.mxu1 %v893_v8 }
  0xc1   :  { %724 = vperm.xlu1 %953, %v658_v9   ;;  %v138_v31 = vmul.f32 %v1232_v15, %v93_v10 }
  0xc2   :  { %v329_v7 = vpop.permute.xlu0 %328 }
  0xc5   :  { %729 = vperm.xlu1 %953, %v659_v12   ;;  %v183_v19 = vpop.permute.xlu1 %182 }
  0xc6   :  { %v222_v30 = vmul.f32 %v1230_v14, %v183_v19 }
  0xc8   :  { %v238_v34 = vadd.f32 %v222_v30, %v138_v31  ;;  %v384_v30 = vld [vmem:[%s1362_s3 + $0x58] sm:$0xff]  ;;  %v377_v31 = vld [vmem:[%s1362_s3 + $0x20] sm:$0xff] }
  0xc9   :  { %739 = vperm.xlu1 %953, %v661_v21  }
  0xca   :  { %v294_v24 = vpop.permute.xlu1 %293  ;;  %v350_v37 = vadd.f32 %v309_v36, %v238_v34  ;;  %v386_v34 = vld [vmem:[%s1362_s3 + $0x68] sm:$0xff]  ;;  %v387_v36 = vld [vmem:[%s1362_s3 + $0x70] sm:$0xff] }
  0xcb   :  { %v347_v25 = vadd.f32 %v294_v24, %v235_v23 }
  0xcc   :  { %v366_v42 = vmax.f32 %v350_v37, 0.0  ;;  %v380_v37 = vld [vmem:[%s1362_s3 + $0x38] sm:$0xff] }
  0xcd   :  { %v363_v27 = vmax.f32 %v347_v25, 0.0 }
  0xce   :  { %v98_v28 = vpop.permute.xlu1 %97 }
  0xcf   :  { %v897_v29 = vpack.c.bf16 %v364_v26, %v363_v27  ;;  %v139_v47 = vmul.f32 %v1232_v15, %v98_v28  ;;  %v375_v28 = vld [vmem:[%s1362_s3 + $0x10] sm:$0xff] }
  0xd1   :  { %898 = vmatprep.subr.bf16.mxu0 %v897_v29  ;;  %920 = vmatprep.subr.bf16.mxu1 %v897_v29  ;;  %v239_v55 = vadd.f32 %v223_v50, %v139_v47 }
  0xd2   :  { %v103_v54 = vpop.permute.xlu1 %102  ;;  %900 = vmatpush3.bf16.msra.mxu0 %v897_v29  ;;  %928 = vmatpush3.bf16.msra.mxu1 %v897_v29  ;;  %v383_v29 = vld [vmem:[%s1362_s3 + $0x50] sm:$0xff] }
  0xd3   :  { %v140_v46 = vmul.f32 %v1232_v15, %v103_v54  ;;  %v376_v54 = vld [vmem:[%s1362_s3 + $0x18] sm:$0xff] }
  0xd7   :  { %v191_v35 = vpop.permute.xlu1 %190 }
  0xd8   :  { %v224_v57 = vmul.f32 %v1230_v14, %v191_v35  ;;  %v379_v35 = vld [vmem:[%s1362_s3 + $0x30] sm:$0xff] }
  0xda   :  { %v240_v48 = vadd.f32 %v224_v57, %v140_v46 }
  0xdc   :  { %v304_v39 = vpop.permute.xlu1 %303  ;;  %v352_v53 = vadd.f32 %v319_v51, %v240_v48 }
  0xdd   :  { %v349_v40 = vadd.f32 %v304_v39, %v237_v38  ;;  %v388_v38 = vld [vmem:[%s1362_s3 + $0x78] sm:$0xff]  ;;  %v408_v39 = vpop.permute.xlu0 %407 }
  0xde   :  { %v368_v60 = vmax.f32 %v352_v53, 0.0 }
  0xdf   :  { %v365_v41 = vmax.f32 %v349_v40, 0.0 }
  0xe0   :  { %v108_v43 = vpop.permute.xlu1 %107 }
  0xe1   :  { %v901_v44 = vpack.c.bf16 %v366_v42, %v365_v41  ;;  %v141_v62 = vmul.f32 %v1232_v15, %v108_v43  ;;  %v418_v41 = vpop.permute.xlu0 %417 }
  0xe3   :  { %902 = vmatprep.subr.bf16.mxu0 %v901_v44  ;;  %921 = vmatprep.subr.bf16.mxu1 %v901_v44  ;;  %v241_v9 = vadd.f32 %v225_v5, %v141_v62 }
  0xe4   :  { %v113_v45 = vpop.permute.xlu1 %112  ;;  %904 = vmatpush3.bf16.msra.mxu0 %v901_v44  ;;  %929 = vmatpush3.bf16.msra.mxu1 %v901_v44 }
  0xe5   :  { %v142_v1 = vmul.f32 %v1232_v15, %v113_v45  ;;  %v665_v43 = vpop.permute.xlu0 %664 }
  0xe9   :  { %v199_v49 = vpop.permute.xlu1 %198  ;;  %v428_v45 = vpop.permute.xlu0 %427 }
  0xea   :  { %v226_v0 = vmul.f32 %v1230_v14, %v199_v49 }
  0xec   :  { %v242_v3 = vadd.f32 %v226_v0, %v142_v1 }
  0xed   :  { %v433_v46 = vpop.permute.xlu0 %432 }
  0xee   :  { %v314_v56 = vpop.permute.xlu1 %313  ;;  %v354_v8 = vadd.f32 %v329_v7, %v242_v3 }
  0xef   :  { %v351_v58 = vadd.f32 %v314_v56, %v239_v55 }
  0xf0   :  { %v370_v18 = vmax.f32 %v354_v8, 0.0 }
  0xf1   :  { %v367_v59 = vmax.f32 %v351_v58, 0.0  ;;  %v438_v48 = vpop.permute.xlu0 %437 }
  0xf2   :  { %v118_v61 = vpop.permute.xlu1 %117 }
  0xf3   :  { %v905_v63 = vpack.c.bf16 %v368_v60, %v367_v59  ;;  %v143_v11 = vmul.f32 %v1232_v15, %v118_v61 }
  0xf5   :  { %906 = vmatprep.subr.bf16.mxu0 %v905_v63  ;;  %922 = vmatprep.subr.bf16.mxu1 %v905_v63  ;;  %v243_v22 = vadd.f32 %v227_v13, %v143_v11  ;;  %v443_v50 = vpop.permute.xlu0 %442 }
  0xf6   :  { %v123_v52 = vpop.permute.xlu1 %122  ;;  %908 = vmatpush3.bf16.msra.mxu0 %v905_v63  ;;  %930 = vmatpush3.bf16.msra.mxu1 %v905_v63 }
  0xf7   :  { %v144_v20 = vmul.f32 %v1232_v15, %v123_v52  ;;  %v382_v15 = vld [vmem:[%s1362_s3 + $0x48] sm:$0xff] }
  0xf9   :  { %v448_v53 = vpop.permute.xlu0 %447 }
  0xfb   :  { %v207_v4 = vpop.permute.xlu1 %206 }
  0xfc   :  { %v228_v16 = vmul.f32 %v1230_v14, %v207_v4  ;;  %v374_v14 = vld [vmem:[%s1362_s3 + $0x8] sm:$0xff] }
  0xfd   :  { %v453_v56 = vpop.permute.xlu0 %452 }
  0xfe   :  { %v244_v23 = vadd.f32 %v228_v16, %v144_v20 }
 0x100   :  { %v324_v10 = vpop.permute.xlu1 %323 }
 0x101   :  { %v353_v12 = vadd.f32 %v324_v10, %v241_v9  ;;  %v458_v59 = vpop.permute.xlu0 %457 }
 0x103   :  { %v369_v17 = vmax.f32 %v353_v12, 0.0 }
 0x104   :  { %v334_v19 = vpop.permute.xlu1 %333 }
 0x105   :  { %v909_v21 = vpack.c.bf16 %v370_v18, %v369_v17  ;;  %v355_v2 = vadd.f32 %v334_v19, %v243_v22  ;;  %v463_v61 = vpop.permute.xlu0 %462 }
 0x107   :  { %910 = vmatprep.subr.bf16.mxu0 %v909_v21  ;;  %923 = vmatprep.subr.bf16.mxu1 %v909_v21  ;;  %v371_v26 = vmax.f32 %v355_v2, 0.0 }
 0x108   :  { %v339_v24 = vpop.permute.xlu1 %338  ;;  %912 = vmatpush3.bf16.msra.mxu0 %v909_v21  ;;  %931 = vmatpush3.bf16.msra.mxu1 %v909_v21 }
 0x109   :  { %v356_v25 = vadd.f32 %v339_v24, %v244_v23  ;;  %v468_v18 = vpop.permute.xlu0 %467 }
 0x10b   :  { %v372_v27 = vmax.f32 %v356_v25, 0.0 }
 0x10c   :  { %v413_v40 = vpop.permute.xlu1 %412 }
 0x10d   :  { %v913_v6 = vpack.c.bf16 %v372_v27, %v371_v26 }
 0x10f   :  { %914 = vmatprep.subr.bf16.mxu0 %v913_v6  ;;  %924 = vmatprep.subr.bf16.mxu1 %v913_v6 }
 0x110   :  { %916 = vmatpush3.bf16.msra.mxu0 %v913_v6  ;;  %932 = vmatpush3.bf16.msra.mxu1 %v913_v6  ;;  %v423_v42 = vpop.permute.xlu1 %422 }
 0x113   :  { %862 = vmatmul.mubr.f32.vlgmr.msra.gmra.mrb[0].mxu0 %v374_v14  ;;  %874 = vmatmul.mubr.f32.vlgmr.msra.gmra.mrb[0].mxu1 %v382_v15 }
 0x114   :  { %864 = vmatprep.mubr.f32.mxu0 %v375_v28  ;;  %876 = vmatprep.mubr.f32.mxu1 %v383_v29  ;;  %v670_v44 = vpop.permute.xlu1 %669 }
 0x117   :  { %865 = vmatmul.mubr.f32.gmra.mrb[2].mxu0 %v376_v54  ;;  %877 = vmatmul.mubr.f32.gmra.mrb[2].mxu1 %v384_v30 }
 0x118   :  { %867 = vmatprep.mubr.f32.mxu0 %v377_v31  ;;  %879 = vmatprep.mubr.f32.mxu1 %v385_v32  ;;  %v675_v57 = vpop.permute.xlu1 %674 }
 0x11b   :  { %868 = vmatmul.mubr.f32.gmra.mrb[4].mxu0 %v378_v33  ;;  %880 = vmatmul.mubr.f32.gmra.mrb[4].mxu1 %v386_v34 }
 0x11c   :  { %870 = vmatprep.mubr.f32.mxu0 %v379_v35  ;;  %882 = vmatprep.mubr.f32.mxu1 %v387_v36  ;;  %v680_v47 = vpop.permute.xlu1 %679 }
 0x11f   :  { %871 = vmatmul.mubr.f32.gmra.mrb[6].mxu0 %v380_v37  ;;  %883 = vmatmul.mubr.f32.gmra.mrb[6].mxu1 %v388_v38  ;;  %v473_v38 = vpop.permute.xlu0 %472 }
 0x120   :  { %v685_v49 = vpop.permute.xlu1 %684 }
 0x124   :  { %v690_v51 = vpop.permute.xlu1 %689 }
 0x128   :  { %v695_v55 = vpop.permute.xlu1 %694 }
 0x12c   :  { %v700_v58 = vpop.permute.xlu1 %699 }
 0x130   :  { %v705_v60 = vpop.permute.xlu1 %704 }
 0x134   :  { %v710_v4 = vpop.permute.xlu1 %709 }
 0x138   :  { %v715_v6 = vpop.permute.xlu1 %714 }
 0x1e6   :  { %v863_v63 = vpop.f32.mrb[0].mxu0  ;;  %v875_v52 = vpop.f32.mrb[0].mxu1 }
 0x1e7   :  { %v557_v0 = vadd.f32 %v863_v63, %v413_v40  ;;  %v551_v1 = vpop.f32.mrb[1].mxu0  ;;  %v591_v62 = vpop.f32.mrb[1].mxu1 }
 0x1e8   :  { %v552_v3 = vadd.f32 %v551_v1, %v408_v39  ;;  %v592_v34 = vadd.f32 %v591_v62, %v448_v53  ;;  %v597_v39 = vadd.f32 %v875_v52, %v453_v56 }
 0x1e9   :  { %v631_v5 = vmax.f32 %v557_v0, 0.0 }
 0x1ea   :  { %v630_v7 = vmax.f32 %v552_v3, 0.0  ;;  %v866_v8 = vpop.f32.mrb[2].mxu0  ;;  %v878_v9 = vpop.f32.mrb[2].mxu1  ;;  %v639_v63 = vmax.f32 %v597_v39, 0.0 }
 0x1eb   :  { %v743_v10 = vmul.f32 %v670_v44, %v631_v5  ;;  %v567_v11 = vadd.f32 %v866_v8, %v423_v42  ;;  %v561_v12 = vpop.f32.mrb[3].mxu0  ;;  %v601_v13 = vpop.f32.mrb[3].mxu1  ;;  %v607_v0 = vadd.f32 %v878_v9, %v463_v61 }
 0x1ec   :  { %v742_v16 = vmul.f32 %v665_v43, %v630_v7  ;;  %v562_v17 = vadd.f32 %v561_v12, %v418_v41  ;;  %v720_v44 = vpop.permute.xlu1 %719  ;;  %v478_v3 = vpop.permute.xlu0 %477  ;;  %v751_v56 = vmul.f32 %v710_v4, %v639_v63 }
 0x1ed   :  { %v633_v20 = vmax.f32 %v567_v11, 0.0 }
 0x1ee   :  { %v758_v19 = vadd.f32 %v743_v10, %v742_v16  ;;  %v632_v21 = vmax.f32 %v562_v17, 0.0  ;;  %v869_v22 = vpop.f32.mrb[4].mxu0  ;;  %v881_v2 = vpop.f32.mrb[4].mxu1 }
 0x1ef   :  { %v577_v23 = vadd.f32 %v869_v22, %v433_v46  ;;  %v571_v24 = vpop.f32.mrb[5].mxu0  ;;  %v611_v25 = vpop.f32.mrb[5].mxu1  ;;  %v745_v14 = vmul.f32 %v680_v47, %v633_v20  ;;  %v617_v52 = vadd.f32 %v881_v2, %v473_v38 }
 0x1f0   :  { %v744_v26 = vmul.f32 %v675_v57, %v632_v21  ;;  %v572_v27 = vadd.f32 %v571_v24, %v428_v45  ;;  %v638_v45 = vmax.f32 %v592_v34, 0.0  ;;  %v602_v57 = vadd.f32 %v601_v13, %v458_v59  ;;  %v725_v5 = vpop.permute.xlu1 %724 }
 0x1f1   :  { %v635_v28 = vmax.f32 %v577_v23, 0.0  ;;  %v612_v62 = vadd.f32 %v611_v25, %v468_v18  ;;  %v643_v13 = vmax.f32 %v617_v52, 0.0 }
 0x1f2   :  { %v759_v15 = vadd.f32 %v758_v19, %v744_v26  ;;  %v634_v29 = vmax.f32 %v572_v27, 0.0  ;;  %v872_v54 = vpop.f32.mrb[6].mxu0  ;;  %v884_v30 = vpop.f32.mrb[6].mxu1  ;;  %v750_v53 = vmul.f32 %v705_v60, %v638_v45 }
 0x1f3   :  { %v587_v31 = vadd.f32 %v872_v54, %v443_v50  ;;  %v581_v32 = vpop.f32.mrb[7].mxu0  ;;  %v621_v33 = vpop.f32.mrb[7].mxu1  ;;  %v747_v40 = vmul.f32 %v690_v51, %v635_v28  ;;  %v641_v51 = vmax.f32 %v607_v0, 0.0  ;;  %v642_v10 = vmax.f32 %v612_v62, 0.0 }
 0x1f4   :  { %v746_v35 = vmul.f32 %v685_v49, %v634_v29  ;;  %v760_v36 = vadd.f32 %v759_v15, %v745_v14  ;;  %v582_v37 = vadd.f32 %v581_v32, %v438_v48  ;;  %v640_v49 = vmax.f32 %v602_v57, 0.0  ;;  %v730_v9 = vpop.permute.xlu1 %729 }
 0x1f5   :  { %v637_v42 = vmax.f32 %v587_v31, 0.0  ;;  %v622_v59 = vadd.f32 %v621_v33, %v478_v3  ;;  %v753_v12 = vmul.f32 %v720_v44, %v641_v51  ;;  %v754_v16 = vmul.f32 %v725_v5, %v642_v10 }
 0x1f6   :  { %v761_v41 = vadd.f32 %v760_v36, %v746_v35  ;;  %v636_v43 = vmax.f32 %v582_v37, 0.0  ;;  %v752_v8 = vmul.f32 %v715_v6, %v640_v49  ;;  %v755_v18 = vmul.f32 %v730_v9, %v643_v13 }
 0x1f7   :  { %v749_v50 = vmul.f32 %v700_v58, %v637_v42  ;;  %v644_v60 = vmax.f32 %v622_v59, 0.0  ;;  %v780_v28 = vstv %s1365_s6 }
 0x1f8   :  { %v748_v46 = vmul.f32 %v695_v55, %v636_v43  ;;  %v762_v47 = vadd.f32 %v761_v41, %v747_v40  ;;  %v483_v55 = vpop.permute.xlu0 %482  ;;  %v740_v2 = vpop.permute.xlu1 %739 }
 0x1f9   :  { %v627_v61 = vadd.f32 %v884_v30, %v483_v55 }
 0x1fa   :  { %v763_v1 = vadd.f32 %v762_v47, %v748_v46 }
 0x1fb   :  { %v645_v19 = vmax.f32 %v627_v61, 0.0 }
 0x1fc   :  { %v764_v48 = vadd.f32 %v763_v1, %v749_v50  ;;  %v735_v4 = vpop.permute.xlu0 %734 }
 0x1fd   :  { %v756_v21 = vmul.f32 %v735_v4, %v644_v60  ;;  %v757_v23 = vmul.f32 %v740_v2, %v645_v19 }
 0x1fe   :  { %v765_v7 = vadd.f32 %v764_v48, %v750_v53 }
 0x200   :  { %v766_v11 = vadd.f32 %v765_v7, %v751_v56 }
 0x202   :  { %v767_v58 = vadd.f32 %v766_v11, %v752_v8 }
 0x204   :  { %v768_v17 = vadd.f32 %v767_v58, %v753_v12 }
 0x206   :  { %v769_v20 = vadd.f32 %v768_v17, %v754_v16 }
 0x208   :  { %v770_v22 = vadd.f32 %v769_v20, %v755_v18 }
 0x20a   :  { %v771_v24 = vadd.f32 %v770_v22, %v756_v21 }
 0x20c   :  { %v772_v25 = vadd.f32 %v771_v24, %v757_v23 }
 0x20e   :  { %v773_v26 = vrot.slane %v772_v25, 4 }
 0x210   :  { %v774_v27 = vadd.f32 %v773_v26, %v772_v25 }
 0x212   :  { %v775_v6 = vrot.slane %v774_v27, 2 }
 0x214   :  { %v776_v14 = vadd.f32 %v775_v6, %v774_v27 }
 0x216   :  { %v777_v15 = vrot.slane %v776_v14, 1 }
 0x218   :  { %v778_v29 = vadd.f32 %v777_v15, %v776_v14 }
 0x21a   :  { %v781_v54 = vadd.f32 %v780_v28, %v778_v29 }
 0x21c   :  { %782 = vst [vmem:[#allocation3] sm:$0x1] %v781_v54 }
 0x21d   :  { %965 = shalt.err (!%p962_p4)
}
 0x21e   :  { %s966_s19 = scalar_lea.hbm %s1366_s7, 16 }
 0x21f   :  { %p967_p5 = scmp.ne.s32.totalorder %s1366_s7, %s966_s19  ;;  %p970_p6 = scmp.lt.u32.totalorder %s966_s19, %s1366_s7 }
 0x221   :  { %p972_p7 = pnand %p970_p6, %p967_p5 }
 0x223   :  { %975 = shalt.err (!%p972_p7)
}
 0x224   :  { %792 = dma.vmem_to_hbm [thread:$0]  %s790_s14, 16, %s1366_s7, [#allocation4]  }
 0x225   :  { %976 = dma.done.wait [#allocation4], 16  }
 0x226   :  { %977 = vsyncadd [#allocation4], 4294967280 }
 0x227   :  { %796 = vsyncpa [#allocation4], 1 }

</bundles_post_ra>
